<compile_context>
chip_gen: v7x
topology: tpu7x:2x2x1
jax: 0.10.0
libtpu: 0.0.40
codegen_flags: <defaults>
</compile_context>

<pallas_src>
import functools

import jax
import jax.numpy as jnp
from jax.experimental import pallas as pl
from jax.experimental.pallas import tpu as pltpu


def _round_up(x, m):
    return (x + m - 1) // m * m


def _head_kernel(x_ref, w_ref, b_ref, o_ref):
    # One MXU dot over the full (flattened) K dim per M-row tile; bias fused
    # into the writeback.  Accumulation is f32 regardless of input dtype.
    acc = jnp.dot(x_ref[...], w_ref[...], preferred_element_type=jnp.float32)
    o_ref[...] = (acc + b_ref[...]).astype(o_ref.dtype)


def _pick_tile_m(tm_request, M, K, Np, mm_bytes, out_bytes,
                 vmem_budget=24 * 1024 * 1024):
    """Clamp the M tile so the pipelined working set fits comfortably in VMEM."""
    # Resident (single-buffered, constant index_map): W^T and bias.
    resident = K * Np * mm_bytes + Np * 4
    # Per-row-of-tile cost, double-buffered inputs and outputs.
    per_row = 2 * (K * mm_bytes) + 2 * (Np * out_bytes)
    avail = max(vmem_budget - resident, per_row * 8)
    tm_cap = max(8, (avail // per_row) // 8 * 8)
    tm = min(tm_request, tm_cap, _round_up(M, 8))
    return _round_up(max(tm, 8), 8)


@functools.partial(jax.jit, static_argnames=("tm", "compute_dtype"))
def supervised_head(x, weight, bias, *, tm=256, compute_dtype=None):
    """
    PatchTST SupervisedHead forward.

    x:      (B, C, num_patches, d_model)
    weight: (pred_len, linear_dim)   -- PyTorch nn.Linear layout,
                                        linear_dim = num_patches * d_model
    bias:   (pred_len,)
    returns (B, C, pred_len)

    Dropout (p=0.0 default / eval mode) is the identity, so it is a no-op.
    """
    B, C, P, D = x.shape
    K = P * D
    N = weight.shape[0]
    assert weight.shape[1] == K, (weight.shape, K)
    M = B * C

    out_dtype = x.dtype
    # Optional reduced-precision matmul inputs (f32 accumulation preserved).
    mm_dtype = compute_dtype if compute_dtype is not None else x.dtype
    mm_bytes = jnp.dtype(mm_dtype).itemsize
    out_bytes = jnp.dtype(out_dtype).itemsize

    # ---- layout prep (runs under jit; the weight transpose/pad is static for
    #      fixed weights and gets hoisted/fused by XLA) ----
    x_flat = x.reshape(M, K).astype(mm_dtype)          # (M, K)
    w_t = weight.T.astype(mm_dtype)                    # (K, N)
    b_f32 = bias.astype(jnp.float32).reshape(1, N)     # (1, N)

    # Lane-dense output: pad N (pred_len) up to a multiple of 128 so the store
    # path is unmasked full-lane vst and MXU columns are not wasted.
    Np = _round_up(N, 128)
    if Np != N:
        w_t = jnp.pad(w_t, ((0, 0), (0, Np - N)))
        b_f32 = jnp.pad(b_f32, ((0, 0), (0, Np - N)))

    # M tiling: big contiguous DMAs, VMEM-bounded, parallel grid axis.
    tm_eff = _pick_tile_m(tm, M, K, Np, mm_bytes, out_bytes)
    Mp = _round_up(M, tm_eff)
    if Mp != M:
        x_flat = jnp.pad(x_flat, ((0, Mp - M), (0, 0)))

    grid = (Mp // tm_eff,)

    out = pl.pallas_call(
        _head_kernel,
        out_shape=jax.ShapeDtypeStruct((Mp, Np), out_dtype),
        grid_spec=pltpu.PrefetchScalarGridSpec(
            num_scalar_prefetch=0,
            grid=grid,
            in_specs=[
                # x row tile: (tm, full K) -- one big contiguous DMA per step.
                pl.BlockSpec((tm_eff, K), lambda i: (i, 0)),
                # W^T fully resident (constant block index -> fetched once).
                pl.BlockSpec((K, Np), lambda i: (0, 0)),
                # bias, resident.
                pl.BlockSpec((1, Np), lambda i: (0, 0)),
            ],
            out_specs=pl.BlockSpec((tm_eff, Np), lambda i: (i, 0)),
        ),
        compiler_params=pltpu.CompilerParams(
            # Row tiles are independent -> shard across TensorCores (v7x).
            dimension_semantics=("parallel",),
        ),
    )(x_flat, w_t, b_f32)

    # Strip M / N padding and restore (B, C, pred_len).
    return out[:M, :N].reshape(B, C, N)


def _init_params(key, linear_dim, pred_len, dtype=jnp.float32):
    # Deterministic init mirroring nn.Linear's shapes (uniform +/- 1/sqrt(K)).
    kw, kb = jax.random.split(key)
    bound = 1.0 / float(linear_dim) ** 0.5
    weight = jax.random.uniform(kw, (pred_len, linear_dim), dtype, -bound, bound)
    bias = jax.random.uniform(kb, (pred_len,), dtype, -bound, bound)
    return weight, bias


if __name__ == "__main__":
    # Small shapes consistent with the module's forward:
    # batch=2, channels=4, num_patches=8, d_model=32 -> linear_dim=256, pred_len=16
    B, C, P, D = 2, 4, 8, 32
    linear_dim = P * D
    pred_len = 16

    key = jax.random.PRNGKey(0)
    kx, kp = jax.random.split(key)
    x = jax.random.normal(kx, (B, C, P, D), dtype=jnp.float32)
    weight, bias = _init_params(kp, linear_dim, pred_len)

    y = supervised_head(x, weight, bias)
    y = jax.block_until_ready(y)

    # Reference check (plain JAX) for correctness.
    ref = x.reshape(B, C, linear_dim) @ weight.T + bias
    assert y.shape == (B, C, pred_len), y.shape
    assert jnp.allclose(y, ref, atol=1e-4, rtol=1e-4)

    print("KERNEL_OK")
</pallas_src>

<mosaic_0001>
module attributes {stable_mosaic.version = 11 : i64} {
  func.func @_head_kernel(%arg0: i32, %arg1: memref<8x256xf32, #tpu.memory_space<vmem>>, %arg2: memref<256x128xf32, #tpu.memory_space<vmem>>, %arg3: memref<1x128xf32, #tpu.memory_space<vmem>>, %arg4: memref<8x128xf32, #tpu.memory_space<vmem>>) attributes {dimension_semantics = [#tpu.dimension_semantics<parallel>], iteration_bounds = array<i64: 1>, scalar_prefetch = 0 : i64, scratch_operands = 0 : i64, tpu.core_type = #tpu.core_type<tc>, window_params = [{transform_indices = @transform_0, window_bounds = array<i64: 8, 256>}, {pipeline_mode = #tpu.pipeline_mode<synchronous>, transform_indices = @transform_1, window_bounds = array<i64: 256, 128>}, {pipeline_mode = #tpu.pipeline_mode<synchronous>, transform_indices = @transform_2, window_bounds = array<i64: 1, 128>}, {transform_indices = @transform_3, window_bounds = array<i64: 8, 128>}]} {
    %c0 = arith.constant 0 : index
    %c0_0 = arith.constant 0 : index
    %0 = vector.load %arg1[%c0, %c0_0] : memref<8x256xf32, #tpu.memory_space<vmem>>, vector<8x256xf32>
    %c0_1 = arith.constant 0 : index
    %c0_2 = arith.constant 0 : index
    %1 = vector.load %arg2[%c0_1, %c0_2] : memref<256x128xf32, #tpu.memory_space<vmem>>, vector<256x128xf32>
    %cst = arith.constant dense<0.000000e+00> : vector<8x128xf32>
    %2 = tpu.matmul %0, %1, %cst {dimension_numbers = #tpu.dot_dimension_numbers<[1], [0], [0], [1], [0, 0, 1, 1], [], []>} : vector<8x256xf32>, vector<256x128xf32>, vector<8x128xf32> -> vector<8x128xf32>
    %c0_3 = arith.constant 0 : index
    %c0_4 = arith.constant 0 : index
    %3 = vector.load %arg3[%c0_3, %c0_4] : memref<1x128xf32, #tpu.memory_space<vmem>>, vector<1x128xf32>
    %4 = vector.broadcast %3 : vector<1x128xf32> to vector<8x128xf32>
    %5 = arith.addf %2, %4 : vector<8x128xf32>
    %c0_5 = arith.constant 0 : index
    %c0_6 = arith.constant 0 : index
    %6 = vector.load %arg4[%c0_5, %c0_6] : memref<8x128xf32, #tpu.memory_space<vmem>>, vector<8x128xf32>
    tpu.vector_store %arg4[%c0_5, %c0_6], %5 {strides = array<i32>} : memref<8x128xf32, #tpu.memory_space<vmem>>, vector<8x128xf32>,
    return
  }
  func.func @transform_0(%arg0: i32) -> (i32, i32) {
    %c0_i32 = arith.constant 0 : i32
    %c0_i32_0 = arith.constant 0 : i32
    return %arg0, %c0_i32 : i32, i32
  }
  func.func @transform_1(%arg0: i32) -> (i32, i32) {
    %c0_i32 = arith.constant 0 : i32
    %c0_i32_0 = arith.constant 0 : i32
    %c0_i32_1 = arith.constant 0 : i32
    return %c0_i32, %c0_i32_0 : i32, i32
  }
  func.func @transform_2(%arg0: i32) -> (i32, i32) {
    %c0_i32 = arith.constant 0 : i32
    %c0_i32_0 = arith.constant 0 : i32
    %c0_i32_1 = arith.constant 0 : i32
    return %c0_i32, %c0_i32_0 : i32, i32
  }
  func.func @transform_3(%arg0: i32) -> (i32, i32) {
    %c0_i32 = arith.constant 0 : i32
    %c0_i32_0 = arith.constant 0 : i32
    return %arg0, %c0_i32 : i32, i32
  }
}

</mosaic_0001>

<bundles_post_ra>
// kernel: supervised_head.1
= control target key start
LH: loop header
LB: loop body
LE: loop exit
PB: predicated region body
PF: predicated region fallthrough
CT: control target
= control target key end

     0   :  { %s372_s0 = inlined_call_operand.vmem [shape: f32[8,256], index: 0, kind: input, shape index: {}]   ;;  %s373_s1 = inlined_call_operand.vmem [shape: f32[256,128], index: 1, kind: input, shape index: {}]   ;;  %s374_s2 = inlined_call_operand.vmem [shape: f32[1,128], index: 2, kind: input, shape index: {}]   ;;  %s375_s3 = inlined_call_operand.hbm [shape: f32[8,128], index: 3, kind: output, shape index: {}]  }
   0x1   :  { %v33_v0 = vld [vmem:[%s373_s1 + $0x80] sm:$0xff]  ;;  %v34_v1 = vld [vmem:[%s373_s1 + $0x88] sm:$0xff]  ;;  %v35_v5 = vld [vmem:[%s373_s1 + $0x90] sm:$0xff] }
   0x2   :  { %v17_v2 = vld [vmem:[%s373_s1] sm:$0xff]  ;;  %v177_v3 = vpack.c.bf16 %v34_v1, %v33_v0  ;;  %v18_v4 = vld [vmem:[%s373_s1 + $0x8] sm:$0xff]  ;;  %v36_v6 = vld [vmem:[%s373_s1 + $0x98] sm:$0xff] }
   0x3   :  { %v179_v7 = vpack.c.bf16 %v18_v4, %v17_v2  ;;  %v181_v8 = vpack.c.bf16 %v36_v6, %v35_v5  ;;  %v19_v9 = vld [vmem:[%s373_s1 + $0x10] sm:$0xff]  ;;  %v20_v10 = vld [vmem:[%s373_s1 + $0x18] sm:$0xff]  ;;  %v37_v11 = vld [vmem:[%s373_s1 + $0xa0] sm:$0xff] }
   0x4   :  { %178 = vmatprep.subr.bf16.mxu0 %v177_v3  ;;  %v38_v12 = vld [vmem:[%s373_s1 + $0xa8] sm:$0xff]  ;;  %v183_v13 = vpack.c.bf16 %v20_v10, %v19_v9  ;;  %v21_v15 = vld [vmem:[%s373_s1 + $0x20] sm:$0xff]  ;;  %v39_v17 = vld [vmem:[%s373_s1 + $0xb0] sm:$0xff] }
   0x5   :  { %180 = vmatpush3.bf16.msra.mxu0 %v179_v7  ;;  %v185_v14 = vpack.c.bf16 %v38_v12, %v37_v11  ;;  %v22_v16 = vld [vmem:[%s373_s1 + $0x28] sm:$0xff]  ;;  %v40_v18 = vld [vmem:[%s373_s1 + $0xb8] sm:$0xff]  ;;  %v23_v21 = vld [vmem:[%s373_s1 + $0x30] sm:$0xff] }
   0x6   :  { %182 = vmatprep.subr.bf16.mxu0 %v181_v8  ;;  %v187_v19 = vpack.c.bf16 %v22_v16, %v21_v15  ;;  %v189_v20 = vpack.c.bf16 %v40_v18, %v39_v17  ;;  %v24_v22 = vld [vmem:[%s373_s1 + $0x38] sm:$0xff]  ;;  %v41_v23 = vld [vmem:[%s373_s1 + $0xc0] sm:$0xff]  ;;  %v42_v24 = vld [vmem:[%s373_s1 + $0xc8] sm:$0xff] }
   0x7   :  { %v16_v25 = vld [vmem:[%s372_s0 + $0x8] sm:$0xff] }
   0x8   :  { %120 = vmatprep.mubr.f32.mxu0 %v16_v25 }
   0x9   :  { %184 = vmatpush3.bf16.msra.mxu0 %v183_v13 }
   0xa   :  { %186 = vmatprep.subr.bf16.mxu0 %v185_v14 }
   0xb   :  { %8 = vsyncpa [#allocation3], 0  ;;  %v191_v26 = vpack.c.bf16 %v24_v22, %v23_v21  ;;  %v193_v27 = vpack.c.bf16 %v42_v24, %v41_v23  ;;  %v25_v28 = vld [vmem:[%s373_s1 + $0x40] sm:$0xff]  ;;  %v26_v29 = vld [vmem:[%s373_s1 + $0x48] sm:$0xff]  ;;  %s234_s28 = smov [#allocation2]  }
   0xc   :  { %v43_v30 = vld [vmem:[%s373_s1 + $0xd0] sm:$0xff]  ;;  %v44_v31 = vld [vmem:[%s373_s1 + $0xd8] sm:$0xff]  ;;  %v195_v32 = vpack.c.bf16 %v26_v29, %v25_v28  ;;  %v45_v36 = vld [vmem:[%s373_s1 + $0xe0] sm:$0xff]  ;;  %s133_s29 = sshll.u32 %s234_s28, 4  ;;  %s134_s29 = int_to_ptr.vmem [resolvable:$true] %s133_s29 }
   0xd   :  { %188 = vmatpush3.bf16.msra.mxu0 %v187_v19  ;;  %v197_v33 = vpack.c.bf16 %v44_v31, %v43_v30  ;;  %v27_v34 = vld [vmem:[%s373_s1 + $0x50] sm:$0xff]  ;;  %v28_v35 = vld [vmem:[%s373_s1 + $0x58] sm:$0xff]  ;;  %v46_v37 = vld [vmem:[%s373_s1 + $0xe8] sm:$0xff]  ;;  %p215_p1 = scmp.lt.s32.totalorder %s134_s29, %s134_s29 }
   0xe   :  { %190 = vmatprep.subr.bf16.mxu0 %v189_v20  ;;  %v199_v38 = vpack.c.bf16 %v28_v35, %v27_v34  ;;  %v201_v39 = vpack.c.bf16 %v46_v37, %v45_v36  ;;  %v29_v40 = vld [vmem:[%s373_s1 + $0x60] sm:$0xff]  ;;  %v30_v41 = vld [vmem:[%s373_s1 + $0x68] sm:$0xff]  ;;  %v47_v42 = vld [vmem:[%s373_s1 + $0xf0] sm:$0xff] }
   0xf   :  { %v48_v43 = vld [vmem:[%s373_s1 + $0xf8] sm:$0xff]  ;;  %v203_v44 = vpack.c.bf16 %v30_v41, %v29_v40  ;;  %v31_v46 = vld [vmem:[%s373_s1 + $0x70] sm:$0xff]  ;;  %v15_v49 = vld [vmem:[%s372_s0] sm:$0xff] }
  0x10   :  { %v205_v45 = vpack.c.bf16 %v48_v43, %v47_v42  ;;  %v32_v47 = vld [vmem:[%s373_s1 + $0x78] sm:$0xff]  ;;  %v141_v52 = vld [vmem:[%s374_s2] ss:$0 sm:$0xff]  ;;  %s210_s1 = scalar_lea.vmem %s134_s29, 128 }
  0x11   :  { %192 = vmatpush3.bf16.msra.mxu0 %v191_v26  ;;  %v207_v48 = vpack.c.bf16 %v32_v47, %v31_v46  ;;  %p211_p0 = scmp.ne.s32.totalorder %s134_s29, %s210_s1  ;;  %p216_p2 = scmp.lt.s32.totalorder %s210_s1, %s210_s1 }
  0x12   :  { %194 = vmatprep.subr.bf16.mxu0 %v193_v27 }
  0x13   :  { %p217_p3 = por %p216_p2, %p215_p1 }
  0x15   :  { %196 = vmatpush3.bf16.msra.mxu0 %v195_v32  ;;  %p218_p4 = pnand %p217_p3, %p211_p0 }
  0x16   :  { %198 = vmatprep.subr.bf16.mxu0 %v197_v33 }
  0x19   :  { %200 = vmatpush3.bf16.msra.mxu0 %v199_v38 }
  0x1a   :  { %202 = vmatprep.subr.bf16.mxu0 %v201_v39 }
  0x1d   :  { %204 = vmatpush3.bf16.msra.mxu0 %v203_v44 }
  0x1e   :  { %206 = vmatprep.subr.bf16.mxu0 %v205_v45 }
  0x21   :  { %208 = vmatpush3.bf16.msra.mxu0 %v207_v48 }
  0x24   :  { %121 = vmatmul.mubr.f32.vlgmr.msra.gmra.mrb[0].mxu0 %v15_v49 }
  0xf7   :  { %v174_v50 = vpop.f32.mrb[0].mxu0 }
  0xf8   :  { %v175_v51 = vpop.f32.mrb[1].mxu0 }
  0xf9   :  { %v176_v53 = vadd.f32 %v175_v51, %v174_v50 }
  0xfb   :  { %v123_v54 = vadd.f32 %v176_v53, %v141_v52 }
  0xfd   :  { %126 = vst [vmem:[#allocation2] sm:$0xff] %v123_v54 }
  0xfe   :  { %221 = shalt.err (!%p218_p4)
}
  0xff   :  { %s222_s4 = scalar_lea.hbm %s375_s3, 128 }
 0x100   :  { %p223_p5 = scmp.ne.s32.totalorder %s375_s3, %s222_s4  ;;  %p226_p6 = scmp.lt.u32.totalorder %s222_s4, %s375_s3 }
 0x102   :  { %p228_p7 = pnand %p226_p6, %p223_p5 }
 0x104   :  { %231 = shalt.err (!%p228_p7)
}
 0x105   :  { %136 = dma.vmem_to_hbm [thread:$0]  %s134_s29, 128, %s375_s3, [#allocation3]  }
 0x106   :  { %232 = dma.done.wait [#allocation3], 128  }
 0x107   :  { %233 = vsyncadd [#allocation3], 4294967168 }
 0x108   :  { %140 = vsyncpa [#allocation3], 1 }

</bundles_post_ra>
